<compile_context>
chip_gen: v5e
topology: v5e:2x2
jax: 0.10.0
libtpu: 0.0.40
codegen_flags: <defaults>
</compile_context>

<pallas_src>
import jax
import jax.numpy as jnp
from jax import lax
from jax.experimental import pallas as pl
from jax.experimental.pallas import tpu as pltpu


def _cdiv(a, b):
    return -(-a // b)


def _tpu_supports_bf16_vector():
    """bf16 VPU/EUP/MXU-native path exists on v6e / v7x; v5e and older stay f32."""
    try:
        info = pltpu.get_tpu_info()
        ver = getattr(info, "chip_version", None) or getattr(info, "version", None)
        if ver is not None:
            name = str(ver).lower()
            if any(t in name for t in ("v6", "v7", "7x")):
                return True
            if any(t in name for t in ("v2", "v3", "v4", "v5")):
                return False
    except Exception:
        pass
    try:
        kind = jax.devices()[0].device_kind.lower()
    except Exception:
        return False
    return any(tag in kind for tag in ("v6", "v7", "7x"))


def _tiling(N, tile_n, max_tile, lane=128):
    """Lane-aligned batch tiles, even tile count (v7x 2-TC balance), fat tiles."""
    if tile_n is None:
        n_tiles = 2
        while True:
            t = _cdiv(_cdiv(N, n_tiles), lane) * lane
            if t <= max_tile:
                break
            n_tiles += 2
        tile_n = t
    else:
        tile_n = _cdiv(tile_n, lane) * lane
        n_tiles = max(2, _cdiv(N, tile_n))
        if n_tiles % 2:
            n_tiles += 1
    return tile_n, n_tiles, tile_n * n_tiles


def _prep_params(torch_weights, torch_biases, n_lin, bf16_hidden):
    """Kernel-facing parameter layout.

    hidden weights: torch-native (out, in); cast once to bf16 on v6e/v7x
    first weight:   (h1, 1) f32   (VPU outer product, K = 1)
    last weight:    transposed to (h_last, 1) f32 (VPU mul + sublane reduce)
    biases:         (out, 1) f32 columns, broadcast over lanes
    """
    w_list = []
    for li, w in enumerate(torch_weights):
        w = jnp.asarray(w, jnp.float32)
        if li == n_lin - 1:
            w = w.T
        elif li > 0 and bf16_hidden:
            w = w.astype(jnp.bfloat16)
        w_list.append(w)
    b_list = [jnp.asarray(b, jnp.float32).reshape(-1, 1) for b in torch_biases]
    return w_list, b_list


def _build_specs(tile_n, w_list, b_list, out_rows):
    in_specs = [pl.BlockSpec((1, tile_n), lambda i: (0, i))]
    for w in w_list:
        in_specs.append(pl.BlockSpec(w.shape, lambda i: (0, 0)))
    for b in b_list:
        in_specs.append(pl.BlockSpec(b.shape, lambda i: (0, 0)))
    out_specs = pl.BlockSpec((out_rows, tile_n), lambda i: (0, i))
    return in_specs, out_specs


def _cost(layer_sizes, N_pad, n_chains=1):
    """Advisory cost estimate so XLA overlaps neighbours with this tiny call."""
    n_lin = len(layer_sizes) - 1
    mm = 2 * sum(layer_sizes[i] * layer_sizes[i + 1] for i in range(n_lin))
    flops = int(n_chains * mm * N_pad)
    trans = int(sum(layer_sizes[1:-1]) * N_pad)
    param_bytes = 4 * sum(layer_sizes[i] * layer_sizes[i + 1] + layer_sizes[i + 1]
                          for i in range(n_lin))
    bytes_accessed = int(param_bytes + 4 * N_pad * (1 + n_chains))
    return pl.CostEstimate(flops=flops, transcendentals=trans,
                           bytes_accessed=bytes_accessed)


def make_pinn_forward(layer_sizes, tile_n=None, max_tile=2048, bf16_chain=None):
    """Forward-only Pallas kernel for the PINN MLP (matches torch forward())."""
    n_lin = len(layer_sizes) - 1
    assert n_lin >= 2, "expect at least one hidden layer"
    assert layer_sizes[0] == 1 and layer_sizes[-1] == 1, "PINN scalar in/out"
    if bf16_chain is None:
        bf16_chain = _tpu_supports_bf16_vector()

    def kernel(*refs):
        # refs = (x_ref, w_0..w_{L-1}, b_0..b_{L-1}, o_ref)
        x_ref = refs[0]
        w_refs = refs[1:1 + n_lin]
        b_refs = refs[1 + n_lin:1 + 2 * n_lin]
        o_ref = refs[1 + 2 * n_lin]

        x = x_ref[...]                                        # (1, tn) f32

        # First linear, K = 1: VPU outer product (no MXU).
        z = w_refs[0][...] * x + b_refs[0][...]               # (h1, tn) f32
        if bf16_chain:
            h = jnp.tanh(z.astype(jnp.bfloat16))              # bf16-resident chain
        else:
            h = jnp.tanh(z)

        # Hidden linears: single-pass bf16 MXU dot (f32 accumulate) on v6e/v7x,
        # f32 dot on v5e.  tanh output feeds the next dot directly in bf16.
        for li in range(1, n_lin - 1):
            z = jnp.dot(w_refs[li][...], h,
                        preferred_element_type=jnp.float32) + b_refs[li][...]
            if bf16_chain:
                h = jnp.tanh(z.astype(jnp.bfloat16))
            else:
                h = jnp.tanh(z)

        # Last linear, d_out = 1: VPU multiply + XLU sublane reduction.
        wl = w_refs[n_lin - 1][...]                            # (h_last, 1) f32
        out = jnp.sum(wl * h.astype(jnp.float32), axis=0,
                      keepdims=True) + b_refs[n_lin - 1][...]
        o_ref[...] = out.astype(o_ref.dtype)

    def forward(x, torch_weights, torch_biases):
        """x: (N, 1); torch_weights[i]: (out_i, in_i); torch_biases[i]: (out_i,)."""
        N, d_in = x.shape
        assert d_in == layer_sizes[0] == 1
        tn, n_tiles, N_pad = _tiling(N, tile_n, max_tile)

        x_t = x.reshape(1, N).astype(jnp.float32)
        if N_pad != N:
            x_t = jnp.pad(x_t, ((0, 0), (0, N_pad - N)))   # padded tail is sliced off

        w_list, b_list = _prep_params(torch_weights, torch_biases, n_lin, bf16_chain)
        in_specs, out_specs = _build_specs(tn, w_list, b_list, out_rows=1)

        out_t = pl.pallas_call(
            kernel,
            out_shape=jax.ShapeDtypeStruct((1, N_pad), jnp.float32),
            grid_spec=pltpu.PrefetchScalarGridSpec(
                num_scalar_prefetch=0,
                grid=(n_tiles,),
                in_specs=in_specs,
                out_specs=out_specs,
            ),
            compiler_params=pltpu.CompilerParams(
                dimension_semantics=("parallel",)),
            cost_estimate=_cost(layer_sizes, N_pad, n_chains=1),
        )(x_t, *w_list, *b_list)

        return out_t[:, :N].reshape(N, 1)

    return forward


def make_pinn_value_and_derivs(layer_sizes, tile_n=None, max_tile=2048):
    """Fused psi / dpsi_dx / d2psi_dx2 kernel (forward-mode tangents in-layer).

    Runs in f32 with HIGHEST-precision dots: the PDE residual (-u_xx + ...)
    is precision-sensitive, so the bf16 chain is not used here.
    """
    n_lin = len(layer_sizes) - 1
    assert n_lin >= 2 and layer_sizes[0] == 1 and layer_sizes[-1] == 1
    HI = lax.Precision.HIGHEST

    def kernel(*refs):
        x_ref = refs[0]
        w_refs = refs[1:1 + n_lin]
        b_refs = refs[1 + n_lin:1 + 2 * n_lin]
        o_ref = refs[1 + 2 * n_lin]

        x = x_ref[...]                                        # (1, tn)

        # First layer: z = w0*x + b0 ; dz/dx = w0 ; d2z/dx2 = 0.
        w0 = w_refs[0][...]                                   # (h1, 1)
        z = w0 * x + b_refs[0][...]
        dz = jnp.broadcast_to(w0, z.shape)
        d2z = jnp.zeros_like(z)

        a = jnp.tanh(z)
        s = 1.0 - a * a
        h, dh, d2h = a, s * dz, s * d2z - 2.0 * a * s * (dz * dz)

        for li in range(1, n_lin - 1):
            W = w_refs[li][...]
            z = jnp.dot(W, h, preferred_element_type=jnp.float32,
                        precision=HI) + b_refs[li][...]
            dz = jnp.dot(W, dh, preferred_element_type=jnp.float32, precision=HI)
            d2z = jnp.dot(W, d2h, preferred_element_type=jnp.float32, precision=HI)
            a = jnp.tanh(z)
            s = 1.0 - a * a
            h, dh, d2h = a, s * dz, s * d2z - 2.0 * a * s * (dz * dz)

        wl = w_refs[n_lin - 1][...]                            # (h_last, 1)
        psi = jnp.sum(wl * h, axis=0, keepdims=True) + b_refs[n_lin - 1][...]
        dpsi = jnp.sum(wl * dh, axis=0, keepdims=True)
        d2psi = jnp.sum(wl * d2h, axis=0, keepdims=True)

        # Dense (8, tn) output slab: rows 0..2 = psi, psi', psi''; rows 3..7 pad.
        pad = jnp.zeros((5, psi.shape[1]), jnp.float32)
        o_ref[...] = jnp.concatenate([psi, dpsi, d2psi, pad], axis=0)

    def forward_with_derivs(x, torch_weights, torch_biases):
        N, d_in = x.shape
        assert d_in == layer_sizes[0] == 1
        tn, n_tiles, N_pad = _tiling(N, tile_n, max_tile)

        x_t = x.reshape(1, N).astype(jnp.float32)
        if N_pad != N:
            x_t = jnp.pad(x_t, ((0, 0), (0, N_pad - N)))

        w_list, b_list = _prep_params(torch_weights, torch_biases, n_lin,
                                      bf16_hidden=False)
        in_specs, out_specs = _build_specs(tn, w_list, b_list, out_rows=8)

        out_t = pl.pallas_call(
            kernel,
            out_shape=jax.ShapeDtypeStruct((8, N_pad), jnp.float32),
            grid_spec=pltpu.PrefetchScalarGridSpec(
                num_scalar_prefetch=0,
                grid=(n_tiles,),
                in_specs=in_specs,
                out_specs=out_specs,
            ),
            compiler_params=pltpu.CompilerParams(
                dimension_semantics=("parallel",)),
            cost_estimate=_cost(layer_sizes, N_pad, n_chains=3),
        )(x_t, *w_list, *b_list)

        psi = out_t[0, :N].reshape(N, 1)
        psi_x = out_t[1, :N].reshape(N, 1)
        psi_xx = out_t[2, :N].reshape(N, 1)
        return psi, psi_x, psi_xx

    return forward_with_derivs


def init_params(layer_sizes, key):
    """torch.nn.Linear-style init: U(-1/sqrt(fan_in), +1/sqrt(fan_in))."""
    weights, biases = [], []
    for i in range(len(layer_sizes) - 1):
        fan_in, fan_out = layer_sizes[i], layer_sizes[i + 1]
        key, kw, kb = jax.random.split(key, 3)
        bound = 1.0 / jnp.sqrt(jnp.float32(fan_in))
        w = jax.random.uniform(kw, (fan_out, fan_in), jnp.float32, -bound, bound)
        b = jax.random.uniform(kb, (fan_out,), jnp.float32, -bound, bound)
        weights.append(w)
        biases.append(b)
    return weights, biases


def reference_forward(x, torch_weights, torch_biases):
    """Plain-JAX reference matching torch semantics: h = h @ W.T + b, tanh between."""
    h = x.astype(jnp.float32)
    n_lin = len(torch_weights)
    for li in range(n_lin):
        h = jnp.dot(h, torch_weights[li].T,
                    precision=lax.Precision.HIGHEST) + torch_biases[li]
        if li < n_lin - 1:
            h = jnp.tanh(h)
    return h


if __name__ == "__main__":
    # PINN architecture: 1-D coordinate in, hidden layers, scalar perturbation out.
    layer_sizes = [1, 64, 64, 64, 1]
    N = 500          # collocation points (deliberately not a multiple of the tile)

    key = jax.random.PRNGKey(0)
    key, kx = jax.random.split(key)
    x = jax.random.uniform(kx, (N, 1), jnp.float32, -5.0, 5.0)
    weights, biases = init_params(layer_sizes, key)

    bf16_used = _tpu_supports_bf16_vector()

    # --- forward (matches torch GrossPitaevskiiPINN.forward) ---
    fwd = make_pinn_forward(layer_sizes)
    out = jax.block_until_ready(fwd(x, weights, biases))
    ref = reference_forward(x, weights, biases)
    assert out.shape == (N, 1)
    tol = 5e-2 if bf16_used else 2e-2   # bf16 chain on v6e/v7x; f32 on v5e
    assert jnp.allclose(out, ref, atol=tol, rtol=tol), "forward mismatch vs reference"

    # --- fused psi / psi' / psi'' (PDE residual path; f32 + HIGHEST dots) ---
    fwd_d = make_pinn_value_and_derivs(layer_sizes)
    psi, psi_x, psi_xx = jax.block_until_ready(fwd_d(x, weights, biases))

    def scalar_net(xi):
        return reference_forward(xi.reshape(1, 1), weights, biases)[0, 0]

    ref_dx = jax.vmap(jax.grad(scalar_net))(x[:, 0]).reshape(N, 1)
    ref_dxx = jax.vmap(jax.grad(jax.grad(scalar_net)))(x[:, 0]).reshape(N, 1)
    assert jnp.allclose(psi, ref, atol=2e-3, rtol=2e-3), "psi mismatch"
    assert jnp.allclose(psi_x, ref_dx, atol=5e-3, rtol=5e-3), "psi_x mismatch"
    assert jnp.allclose(psi_xx, ref_dxx, atol=1e-2, rtol=1e-2), "psi_xx mismatch"

    # TODO(synk): weighted_hermite (scipy Hermite polynomials), alpha/beta decay
    # and the scalar loss reductions (pde/riesz/boundary/symmetry) remain at the
    # JAX level; they consume psi/psi'/psi'' produced by the fused kernel above.
    print("KERNEL_OK")
</pallas_src>

<mosaic_0001>
module attributes {stable_mosaic.version = 11 : i64} {
  func.func @kernel(%arg0: i32, %arg1: memref<1x256xf32, #tpu.memory_space<vmem>>, %arg2: memref<64x1xf32, #tpu.memory_space<vmem>>, %arg3: memref<64x64xf32, #tpu.memory_space<vmem>>, %arg4: memref<64x64xf32, #tpu.memory_space<vmem>>, %arg5: memref<64x1xf32, #tpu.memory_space<vmem>>, %arg6: memref<64x1xf32, #tpu.memory_space<vmem>>, %arg7: memref<64x1xf32, #tpu.memory_space<vmem>>, %arg8: memref<64x1xf32, #tpu.memory_space<vmem>>, %arg9: memref<1x1xf32, #tpu.memory_space<vmem>>, %arg10: memref<1x256xf32, #tpu.memory_space<vmem>>) attributes {dimension_semantics = [#tpu.dimension_semantics<parallel>], iteration_bounds = array<i64: 2>, scalar_prefetch = 0 : i64, scratch_operands = 0 : i64, tpu.core_type = #tpu.core_type<tc>, window_params = [{transform_indices = @transform_0, window_bounds = array<i64: 1, 256>}, {pipeline_mode = #tpu.pipeline_mode<synchronous>, transform_indices = @transform_1, window_bounds = array<i64: 64, 1>}, {pipeline_mode = #tpu.pipeline_mode<synchronous>, transform_indices = @transform_2, window_bounds = array<i64: 64, 64>}, {pipeline_mode = #tpu.pipeline_mode<synchronous>, transform_indices = @transform_3, window_bounds = array<i64: 64, 64>}, {pipeline_mode = #tpu.pipeline_mode<synchronous>, transform_indices = @transform_4, window_bounds = array<i64: 64, 1>}, {pipeline_mode = #tpu.pipeline_mode<synchronous>, transform_indices = @transform_5, window_bounds = array<i64: 64, 1>}, {pipeline_mode = #tpu.pipeline_mode<synchronous>, transform_indices = @transform_6, window_bounds = array<i64: 64, 1>}, {pipeline_mode = #tpu.pipeline_mode<synchronous>, transform_indices = @transform_7, window_bounds = array<i64: 64, 1>}, {pipeline_mode = #tpu.pipeline_mode<synchronous>, transform_indices = @transform_8, window_bounds = array<i64: 1, 1>}, {transform_indices = @transform_9, window_bounds = array<i64: 1, 256>}]} {
    %c0 = arith.constant 0 : index
    %c0_0 = arith.constant 0 : index
    %0 = vector.load %arg1[%c0, %c0_0] : memref<1x256xf32, #tpu.memory_space<vmem>>, vector<1x256xf32>
    %c0_1 = arith.constant 0 : index
    %c0_2 = arith.constant 0 : index
    %1 = vector.load %arg2[%c0_1, %c0_2] : memref<64x1xf32, #tpu.memory_space<vmem>>, vector<64x1xf32>
    %2 = vector.broadcast %1 : vector<64x1xf32> to vector<64x256xf32>
    %3 = vector.broadcast %0 : vector<1x256xf32> to vector<64x256xf32>
    %4 = arith.mulf %2, %3 : vector<64x256xf32>
    %c0_3 = arith.constant 0 : index
    %c0_4 = arith.constant 0 : index
    %5 = vector.load %arg6[%c0_3, %c0_4] : memref<64x1xf32, #tpu.memory_space<vmem>>, vector<64x1xf32>
    %6 = vector.broadcast %5 : vector<64x1xf32> to vector<64x256xf32>
    %7 = arith.addf %4, %6 : vector<64x256xf32>
    %8 = math.tanh %7 : vector<64x256xf32>
    %c0_5 = arith.constant 0 : index
    %c0_6 = arith.constant 0 : index
    %9 = vector.load %arg3[%c0_5, %c0_6] : memref<64x64xf32, #tpu.memory_space<vmem>>, vector<64x64xf32>
    %cst = arith.constant dense<0.000000e+00> : vector<64x256xf32>
    %10 = tpu.matmul %9, %8, %cst {dimension_numbers = #tpu.dot_dimension_numbers<[1], [0], [0], [1], [0, 0, 1, 1], [], []>} : vector<64x64xf32>, vector<64x256xf32>, vector<64x256xf32> -> vector<64x256xf32>
    %c0_7 = arith.constant 0 : index
    %c0_8 = arith.constant 0 : index
    %11 = vector.load %arg7[%c0_7, %c0_8] : memref<64x1xf32, #tpu.memory_space<vmem>>, vector<64x1xf32>
    %12 = vector.broadcast %11 : vector<64x1xf32> to vector<64x256xf32>
    %13 = arith.addf %10, %12 : vector<64x256xf32>
    %14 = math.tanh %13 : vector<64x256xf32>
    %c0_9 = arith.constant 0 : index
    %c0_10 = arith.constant 0 : index
    %15 = vector.load %arg4[%c0_9, %c0_10] : memref<64x64xf32, #tpu.memory_space<vmem>>, vector<64x64xf32>
    %cst_11 = arith.constant dense<0.000000e+00> : vector<64x256xf32>
    %16 = tpu.matmul %15, %14, %cst_11 {dimension_numbers = #tpu.dot_dimension_numbers<[1], [0], [0], [1], [0, 0, 1, 1], [], []>} : vector<64x64xf32>, vector<64x256xf32>, vector<64x256xf32> -> vector<64x256xf32>
    %c0_12 = arith.constant 0 : index
    %c0_13 = arith.constant 0 : index
    %17 = vector.load %arg8[%c0_12, %c0_13] : memref<64x1xf32, #tpu.memory_space<vmem>>, vector<64x1xf32>
    %18 = vector.broadcast %17 : vector<64x1xf32> to vector<64x256xf32>
    %19 = arith.addf %16, %18 : vector<64x256xf32>
    %20 = math.tanh %19 : vector<64x256xf32>
    %c0_14 = arith.constant 0 : index
    %c0_15 = arith.constant 0 : index
    %21 = vector.load %arg5[%c0_14, %c0_15] : memref<64x1xf32, #tpu.memory_space<vmem>>, vector<64x1xf32>
    %22 = vector.broadcast %21 : vector<64x1xf32> to vector<64x256xf32>
    %23 = arith.mulf %22, %20 : vector<64x256xf32>
    %cst_16 = arith.constant dense<0.000000e+00> : vector<256xf32>
    %24 = vector.multi_reduction <add>, %23, %cst_16 [0] : vector<64x256xf32> to vector<256xf32>
    %25 = vector.shape_cast %24 : vector<256xf32> to vector<1x256xf32>
    %c0_17 = arith.constant 0 : index
    %c0_18 = arith.constant 0 : index
    %26 = vector.load %arg9[%c0_17, %c0_18] : memref<1x1xf32, #tpu.memory_space<vmem>>, vector<1x1xf32>
    %27 = vector.broadcast %26 : vector<1x1xf32> to vector<1x256xf32>
    %28 = arith.addf %25, %27 : vector<1x256xf32>
    %c0_19 = arith.constant 0 : index
    %c0_20 = arith.constant 0 : index
    %29 = vector.load %arg10[%c0_19, %c0_20] : memref<1x256xf32, #tpu.memory_space<vmem>>, vector<1x256xf32>
    tpu.vector_store %arg10[%c0_19, %c0_20], %28 {strides = array<i32>} : memref<1x256xf32, #tpu.memory_space<vmem>>, vector<1x256xf32>,
    return
  }
  func.func @transform_0(%arg0: i32) -> (i32, i32) {
    %c0_i32 = arith.constant 0 : i32
    %c0_i32_0 = arith.constant 0 : i32
    return %c0_i32, %arg0 : i32, i32
  }
  func.func @transform_1(%arg0: i32) -> (i32, i32) {
    %c0_i32 = arith.constant 0 : i32
    %c0_i32_0 = arith.constant 0 : i32
    %c0_i32_1 = arith.constant 0 : i32
    return %c0_i32, %c0_i32_0 : i32, i32
  }
  func.func @transform_2(%arg0: i32) -> (i32, i32) {
    %c0_i32 = arith.constant 0 : i32
    %c0_i32_0 = arith.constant 0 : i32
    %c0_i32_1 = arith.constant 0 : i32
    return %c0_i32, %c0_i32_0 : i32, i32
  }
  func.func @transform_3(%arg0: i32) -> (i32, i32) {
    %c0_i32 = arith.constant 0 : i32
    %c0_i32_0 = arith.constant 0 : i32
    %c0_i32_1 = arith.constant 0 : i32
    return %c0_i32, %c0_i32_0 : i32, i32
  }
  func.func @transform_4(%arg0: i32) -> (i32, i32) {
    %c0_i32 = arith.constant 0 : i32
    %c0_i32_0 = arith.constant 0 : i32
    %c0_i32_1 = arith.constant 0 : i32
    return %c0_i32, %c0_i32_0 : i32, i32
  }
  func.func @transform_5(%arg0: i32) -> (i32, i32) {
    %c0_i32 = arith.constant 0 : i32
    %c0_i32_0 = arith.constant 0 : i32
    %c0_i32_1 = arith.constant 0 : i32
    return %c0_i32, %c0_i32_0 : i32, i32
  }
  func.func @transform_6(%arg0: i32) -> (i32, i32) {
    %c0_i32 = arith.constant 0 : i32
    %c0_i32_0 = arith.constant 0 : i32
    %c0_i32_1 = arith.constant 0 : i32
    return %c0_i32, %c0_i32_0 : i32, i32
  }
  func.func @transform_7(%arg0: i32) -> (i32, i32) {
    %c0_i32 = arith.constant 0 : i32
    %c0_i32_0 = arith.constant 0 : i32
    %c0_i32_1 = arith.constant 0 : i32
    return %c0_i32, %c0_i32_0 : i32, i32
  }
  func.func @transform_8(%arg0: i32) -> (i32, i32) {
    %c0_i32 = arith.constant 0 : i32
    %c0_i32_0 = arith.constant 0 : i32
    %c0_i32_1 = arith.constant 0 : i32
    return %c0_i32, %c0_i32_0 : i32, i32
  }
  func.func @transform_9(%arg0: i32) -> (i32, i32) {
    %c0_i32 = arith.constant 0 : i32
    %c0_i32_0 = arith.constant 0 : i32
    return %c0_i32, %arg0 : i32, i32
  }
}

</mosaic_0001>

<bundles_post_ra>
// kernel: tpu_custom_call.1
= control target key start
LH: loop header
LB: loop body
LE: loop exit
PB: predicated region body
PF: predicated region fallthrough
CT: control target
= control target key end

     0   :  { %s1629_s0 = inlined_call_operand.vmem [shape: f32[1,512], index: 0, kind: input, shape index: {}]   ;;  %s1630_s1 = inlined_call_operand.vmem [shape: f32[64,1], index: 1, kind: input, shape index: {}]   ;;  %s1631_s2 = inlined_call_operand.vmem [shape: f32[64,64], index: 2, kind: input, shape index: {}]   ;;  %s1632_s3 = inlined_call_operand.vmem [shape: f32[64,64], index: 3, kind: input, shape index: {}]   ;;  %s1633_s4 = inlined_call_operand.vmem [shape: f32[64,1], index: 4, kind: input, shape index: {}]   ;;  %s1634_s5 = inlined_call_operand.vmem [shape: f32[64,1], index: 5, kind: input, shape index: {}]   ;;  %s1635_s6 = inlined_call_operand.vmem [shape: f32[64,1], index: 6, kind: input, shape index: {}]   ;;  %s1636_s7 = inlined_call_operand.vmem [shape: f32[64,1], index: 7, kind: input, shape index: {}]   ;;  %s1637_s8 = inlined_call_operand.<no memory space> [shape: f32[1,1], index: 8, kind: input, shape index: {}]   ;;  %s1638_s9 = inlined_call_operand.hbm [shape: f32[1,512], index: 9, kind: output, shape index: {}]  }
   0x1   :  { %v14_v0 = vstv %s1637_s8 }
   0x2   :  { %15 = vst [vmem:[#allocation2] sm:$0x1] %v14_v0 }
   0x3   :  { %16 = vsyncpa [#allocation4], 0 }
   0x4   :  { %18 = vsyncpa [#allocation4 + $0x1], 0  ;;  %s1321_s11 = smov 0   ;;  %s1323_s12 = smov 0  }
   0x5   :  { %s1325_s13 = smov 0   ;;  %s1327_s14 = smov 0  }
   0x6 LB: > { %s1021_s8 = sadd.s32 4294967295, %s1265_s14   ;;  %s1022_s15 = sadd.s32 4294967294, %s1265_s14   ;;  %s1265_s14 = sphi %s1327_s14, %s1644_s14   ;;  %s1261_s13 = sphi %s1325_s13, %s1643_s13   ;;  %s1257_s12 = sphi %s1323_s12, %s1642_s12   ;;  %s1253_s11 = sphi %s1321_s11, %s1641_s11  }
   0x7   : > { %s1344_s16 = sadd.s32 1, %s1265_s14   ;;  %s225_s17 = sadd.s32 1, %s1261_s13 }
   0x8   : > { %s222_s18 = ssub.s32 %s1265_s14, %s1344_s16  ;;  %p235_p0 = scmp.ne.s32.totalorder %s1261_s13, %s1257_s12 }
   0x9   : > { %p223_p1 = scmp.eq.s32.totalorder %s222_s18, 0  ;;  %p236_p2 = scmp.eq.s32.totalorder %s1021_s8, 1 }
   0xa   : > { %p241_p3 = scmp.ne.s32.totalorder %s1257_s12, %s1253_s11  ;;  %p242_p4 = scmp.eq.s32.totalorder %s1022_s15, 1 }
   0xb   : > { %s1356_s19 = scalar_select %p223_p1, %s1261_s13, %s225_s17  }
   0xc   : > { %p1358_p5 = por %p236_p2, %p235_p0  ;;  %p1362_p6 = por %p242_p4, %p241_p3 }
   0xd   : > { %p1025_p7 = scmp.ge.s32.totalorder %s1265_s14, 1  ;;  %p292_p8 = scmp.lt.s32.totalorder %s1265_s14, 3 }
   0xf   : > { %p293_p9 = pnand %p1025_p7, %p292_p8 }
  0x10   : > { %s1487_s22 = sshll.u32 (!%p293_p9), %s1021_s8, 1  ;;  %s324_s18 = sand.u32 (!%p293_p9), 1, %s1257_s12  }
  0x11   : > { %296 = sbr.rel (%p293_p9) target bundleno = 618 (0x26a), region = 56  ;;  %p328_p10 = scmp.lt.s32.totalorder (!%p293_p9), %s1487_s22, 3 }
  0x12   : > { %s961_s26 = scalar_lea.hbm (!%p293_p9), %s1638_s9, %s1487_s22  ;;  %s951_s29 = scalar_lea.sflag (!%p293_p9), [#allocation4], %s324_s18 }
  0x13   : > { %s965_s28 = sshll.u32 (!%p293_p9), %s961_s26, 4  ;;  %s1223_s17 = scalar_lea.hbm (!%p293_p9), %s1638_s9, 4  ;;  %s966_s28 = int_to_ptr.hbm [resolvable:$true] %s965_s28 }
  0x14   : > { %s1217_s30 = sshra.s32 (!%p293_p9), %s966_s28, 4  ;;  %s1218_s30 = int_to_ptr.hbm [resolvable:$true] %s1217_s30 }
  0x15   : > { %p1224_p0 = scmp.lt.s32.totalorder (!%p293_p9), %s1218_s30, %s1638_s9 }
  0x16   : > { %v409_v1 = vld [vmem:[%s1634_s5 + $0x30] sm:$0xff]  ;;  %v410_v2 = vld [vmem:[%s1634_s5 + $0x38] sm:$0xff]  ;;  %v1267_v4 = vmov 0   ;;  %v338_v5 = vld [vmem:[%s1630_s1 + $0x20] sm:$0xff]  ;;  %s329_s23 = scalar_select %p328_p10, %s1487_s22, 3  ;;  %vm539_vm0 = vcmask 523264  }
  0x17   : > { %v341_v3 = vld [vmem:[%s1630_s1 + $0x38] sm:$0xff]  ;;  %1106 = vset.pattern.permute.xlu2 %v1267_v4  ;;  %1105 = vset.pattern.permute.xlu1 %v1267_v4  ;;  %v340_v6 = vld [vmem:[%s1630_s1 + $0x30] sm:$0xff]  ;;  %v339_v7 = vld [vmem:[%s1630_s1 + $0x28] sm:$0xff]  ;;  %vm942_vm1 = vcmask 1040384   ;;  %s1219_s22 = scalar_lea.hbm %s1218_s30, 2 }
  0x18   : > { %1104 = vset.pattern.permute.xlu0 %v1267_v4  ;;  %443 = vperm.xlu2 %1106, %v409_v1   ;;  %v407_v8 = vld [vmem:[%s1634_s5 + $0x20] sm:$0xff]  ;;  %v408_v9 = vld [vmem:[%s1634_s5 + $0x28] sm:$0xff]  ;;  %v337_v10 = vld [vmem:[%s1630_s1 + $0x18] sm:$0xff]  ;;  %s330_s8 = scalar_lea.vmem %s1629_s0, %s329_s23  ;;  %s1026_s23 = sshll.u32 %s324_s18, 1 }
  0x19   : > { %448 = vperm.xlu1 %1105, %v410_v2   ;;  %379 = vperm.xlu0 %1104, %v341_v3   ;;  %v335_v11 = vld [vmem:[%s1630_s1 + $0x8] sm:$0xff]  ;;  %v406_v12 = vld [vmem:[%s1634_s5 + $0x18] sm:$0xff]  ;;  %v336_v13 = vld [vmem:[%s1630_s1 + $0x10] sm:$0xff]  ;;  %s326_s27 = scalar_lea.vmem [#allocation3], %s1026_s23  ;;  %p1220_p11 = scmp.ne.s32.totalorder %s1218_s30, %s1219_s22 }
  0x1a   : > { %v404_v14 = vld [vmem:[%s1634_s5 + $0x8] sm:$0xff]  ;;  %v405_v15 = vld [vmem:[%s1634_s5 + $0x10] sm:$0xff]  ;;  %v334_v16 = vld [vmem:[%s1630_s1] sm:$0xff]  ;;  %p1225_p1 = scmp.lt.s32.totalorder %s1223_s17, %s1219_s22 }
  0x1b   : > { %v497_v17 = vld [vmem:[%s1635_s6 + $0x30] sm:$0xff]  ;;  %v403_v18 = vld [vmem:[%s1634_s5] sm:$0xff]  ;;  %v498_v19 = vld [vmem:[%s1635_s6 + $0x38] sm:$0xff]  ;;  %p1221_p12 = pnand %p1220_p11, %p1358_p5 }
  0x1c   : > { %v494_v20 = vld [vmem:[%s1635_s6 + $0x18] sm:$0xff]  ;;  %v496_v21 = vld [vmem:[%s1635_s6 + $0x28] sm:$0xff]  ;;  %v495_v22 = vld [vmem:[%s1635_s6 + $0x20] sm:$0xff]  ;;  %p1226_p2 = por %p1225_p1, %p1224_p0 }
  0x1d   : > { %v491_v23 = vld [vmem:[%s1635_s6] sm:$0xff]  ;;  %v493_v24 = vld [vmem:[%s1635_s6 + $0x10] sm:$0xff]  ;;  %v492_v25 = vld [vmem:[%s1635_s6 + $0x8] sm:$0xff]  ;;  %p1222_p13 = pneg %p1221_p12 }
  0x1e   : > { %v672_v26 = vld [vmem:[%s1636_s7 + $0x10] sm:$0xff]  ;;  %v670_v27 = vld [vmem:[%s1636_s7] sm:$0xff]  ;;  %v671_v28 = vld [vmem:[%s1636_s7 + $0x8] sm:$0xff] }
  0x1f   : > { %v675_v29 = vld [vmem:[%s1636_s7 + $0x28] sm:$0xff]  ;;  %v673_v30 = vld [vmem:[%s1636_s7 + $0x18] sm:$0xff]  ;;  %v674_v31 = vld [vmem:[%s1636_s7 + $0x20] sm:$0xff]  ;;  %p1227_p3 = pnand %p1226_p2, %p1222_p13 }
  0x20   : > { %364 = vperm.xlu2 %1106, %v338_v5   ;;  %v676_v32 = vld [vmem:[%s1636_s7 + $0x30] sm:$0xff]  ;;  %v840_v33 = vld [vmem:[%s1633_s4] sm:$0xff]  ;;  %v841_v34 = vld [vmem:[%s1633_s4 + $0x8] sm:$0xff] }
  0x21   : > { %374 = vperm.xlu0 %1104, %v340_v6   ;;  %369 = vperm.xlu1 %1105, %v339_v7   ;;  %v843_v35 = vld [vmem:[%s1633_s4 + $0x18] sm:$0xff]  ;;  %v842_v36 = vld [vmem:[%s1633_s4 + $0x10] sm:$0xff]  ;;  %v844_v39 = vld [vmem:[%s1633_s4 + $0x20] sm:$0xff] }
  0x22   : > { %v677_v37 = vld [vmem:[%s1636_s7 + $0x38] sm:$0xff]  ;;  %v846_v38 = vld [vmem:[%s1633_s4 + $0x30] sm:$0xff]  ;;  %v845_v40 = vld [vmem:[%s1633_s4 + $0x28] sm:$0xff] }
  0x23   : > { %v847_v41 = vld [vmem:[%s1633_s4 + $0x38] sm:$0xff]  ;;  %v930_v42 = vld [vmem:[#allocation2] sm:$0x1] }
  0x24   : > { %v333_v44 = vld [vmem:[%s330_s8] sm:$0x3]  ;;  %s963_s8 = sshll.u32 %s326_s27, 4  ;;  %s964_s8 = int_to_ptr.vmem [resolvable:$true] %s963_s8 }
  0x25   : > { %v1497_v45 = vperm.slane %v333_v44, 0  ;;  %v1499_v46 = vperm.slane %v333_v44, 1  ;;  %v483_v44 = vld [vmem:[%s1631_s2] sm:$0xff] }
  0x28   : > { %433 = vperm.xlu2 %1106, %v407_v8  }
  0x29   : > { %438 = vperm.xlu0 %1104, %v408_v9   ;;  %359 = vperm.xlu1 %1105, %v337_v10  }
  0x30   : > { %349 = vperm.xlu2 %1106, %v335_v11  }
  0x31   : > { %428 = vperm.xlu1 %1105, %v406_v12   ;;  %354 = vperm.xlu0 %1104, %v336_v13  }
  0x38   : > { %418 = vperm.xlu2 %1106, %v404_v14  }
  0x39   : > { %423 = vperm.xlu0 %1104, %v405_v15   ;;  %344 = vperm.xlu1 %1105, %v334_v16  }
  0x40   : > { %531 = vperm.xlu2 %1106, %v497_v17  }
  0x41   : > { %413 = vperm.xlu0 %1104, %v403_v18   ;;  %536 = vperm.xlu1 %1105, %v498_v19  }
  0x48   : > { %516 = vperm.xlu2 %1106, %v494_v20  }
  0x49   : > { %526 = vperm.xlu0 %1104, %v496_v21   ;;  %521 = vperm.xlu1 %1105, %v495_v22  }
  0x50   : > { %501 = vperm.xlu2 %1106, %v491_v23  }
  0x51   : > { %511 = vperm.xlu0 %1104, %v493_v24   ;;  %506 = vperm.xlu1 %1105, %v492_v25  }
  0x58   : > { %690 = vperm.xlu2 %1106, %v672_v26  }
  0x59   : > { %680 = vperm.xlu0 %1104, %v670_v27   ;;  %685 = vperm.xlu1 %1105, %v671_v28  }
  0x60   : > { %705 = vperm.xlu2 %1106, %v675_v29  }
  0x61   : > { %695 = vperm.xlu0 %1104, %v673_v30   ;;  %700 = vperm.xlu1 %1105, %v674_v31  }
  0x68   : > { %710 = vperm.xlu2 %1106, %v676_v32  }
  0x69   : > { %850 = vperm.xlu0 %1104, %v840_v33   ;;  %855 = vperm.xlu1 %1105, %v841_v34  }
  0x70   : > { %865 = vperm.xlu2 %1106, %v843_v35  }
  0x71   : > { %860 = vperm.xlu0 %1104, %v842_v36   ;;  %715 = vperm.xlu1 %1105, %v677_v37  }
  0x72   : > { %v444_v43 = vpop.permute.xlu2 %443 }
  0x78   : > { %880 = vperm.xlu2 %1106, %v846_v38  }
  0x79   : > { %870 = vperm.xlu0 %1104, %v844_v39   ;;  %875 = vperm.xlu1 %1105, %v845_v40  }
  0x7a   : > { %v365_v47 = vpop.permute.xlu2 %364 }
  0x7b   : > { %v395_v63 = vmul.f32 %v1497_v45, %v365_v47  ;;  %v396_v0 = vmul.f32 %v1499_v46, %v365_v47  ;;  %v484_v47 = vld [vmem:[%s1631_s2 + $0x8] sm:$0xff] }
  0x81   : > { %885 = vperm.xlu0 %1104, %v847_v41   ;;  %933 = vperm.xlu1 %1105, %v930_v42  }
  0x82   : > { %v434_v58 = vpop.permute.xlu2 %433 }
  0x83   : > { %v459_v5 = vadd.f32 %v434_v58, %v395_v63  ;;  %v460_v8 = vadd.f32 %v434_v58, %v396_v0 }
  0x8a   : > { %v350_v11 = vpop.permute.xlu2 %349 }
  0x8b   : > { %v449_v48 = vpop.permute.xlu1 %448  ;;  %v380_v49 = vpop.permute.xlu0 %379  ;;  %v389_v22 = vmul.f32 %v1497_v45, %v350_v11  ;;  %v390_v23 = vmul.f32 %v1499_v46, %v350_v11 }
  0x8c   : > { %v401_v50 = vmul.f32 %v1497_v45, %v380_v49  ;;  %v402_v51 = vmul.f32 %v1499_v46, %v380_v49  ;;  %v486_v49 = vld [vmem:[%s1631_s2 + $0x18] sm:$0xff] }
  0x8e   : > { %v465_v52 = vadd.f32 %v449_v48, %v401_v50  ;;  %v466_v53 = vadd.f32 %v449_v48, %v402_v51  ;;  %v485_v48 = vld [vmem:[%s1631_s2 + $0x10] sm:$0xff]  ;;  %v487_v50 = vld [vmem:[%s1631_s2 + $0x20] sm:$0xff]  ;;  %v488_v51 = vld [vmem:[%s1631_s2 + $0x28] sm:$0xff] }
  0x90   : > { %1107 = vtanh.f32 %v465_v52  ;;  %v489_v52 = vld [vmem:[%s1631_s2 + $0x30] sm:$0xff] }
  0x91   : > { %1109 = vtanh.f32 %v466_v53  ;;  %v490_v53 = vld [vmem:[%s1631_s2 + $0x38] sm:$0xff] }
  0x92   : > { %v419_v24 = vpop.permute.xlu2 %418 }
  0x93   : > { %v375_v54 = vpop.permute.xlu0 %374  ;;  %v370_v55 = vpop.permute.xlu1 %369  ;;  %v453_v29 = vadd.f32 %v419_v24, %v389_v22  ;;  %v454_v33 = vadd.f32 %v419_v24, %v390_v23 }
  0x94   : > { %v399_v56 = vmul.f32 %v1497_v45, %v375_v54  ;;  %v400_v57 = vmul.f32 %v1499_v46, %v375_v54  ;;  %v397_v1 = vmul.f32 %v1497_v45, %v370_v55  ;;  %v398_v2 = vmul.f32 %v1499_v46, %v370_v55 }
  0x96   : > { %v1108_v59 = vpop.eup %1107  ;;  %v463_v60 = vadd.f32 %v444_v43, %v399_v56  ;;  %v464_v61 = vadd.f32 %v444_v43, %v400_v57 }
  0x97   : > { %v1110_v62 = vpop.eup %1109  ;;  %572 = vmatpush.msra.mxu0 %v1108_v59 }
  0x98   : > { %1111 = vtanh.f32 %v463_v60  ;;  %613 = vmatpush.msra.mxu1 %v1110_v62 }
  0x99   : > { %1113 = vtanh.f32 %v464_v61 }
  0x9b   : > { %v439_v3 = vpop.permute.xlu0 %438  ;;  %v360_v4 = vpop.permute.xlu1 %359 }
  0x9c   : > { %v461_v6 = vadd.f32 %v439_v3, %v397_v1  ;;  %v462_v7 = vadd.f32 %v439_v3, %v398_v2  ;;  %v393_v12 = vmul.f32 %v1497_v45, %v360_v4  ;;  %v394_v13 = vmul.f32 %v1499_v46, %v360_v4  ;;  %v532_v3 = vpop.permute.xlu2 %531 }
  0x9e   : > { %v1112_v9 = vpop.eup %1111  ;;  %1115 = vtanh.f32 %v461_v6 }
  0x9f   : > { %v1114_v10 = vpop.eup %1113  ;;  %1117 = vtanh.f32 %v462_v7  ;;  %573 = vmatpush.msra.mxu0 %v1112_v9 }
  0xa0   : > { %1119 = vtanh.f32 %v459_v5  ;;  %614 = vmatpush.msra.mxu1 %v1114_v10 }
  0xa1   : > { %1121 = vtanh.f32 %v460_v8 }
  0xa3   : > { %v429_v14 = vpop.permute.xlu1 %428  ;;  %v355_v15 = vpop.permute.xlu0 %354 }
  0xa4   : > { %v1116_v16 = vpop.eup %1115  ;;  %v457_v17 = vadd.f32 %v429_v14, %v393_v12  ;;  %v458_v18 = vadd.f32 %v429_v14, %v394_v13  ;;  %v391_v25 = vmul.f32 %v1497_v45, %v355_v15  ;;  %v392_v26 = vmul.f32 %v1499_v46, %v355_v15  ;;  %v517_v12 = vpop.permute.xlu2 %516 }
  0xa5   : > { %v1118_v19 = vpop.eup %1117  ;;  %574 = vmatpush.msra.mxu0 %v1116_v16 }
  0xa6   : > { %v1120_v20 = vpop.eup %1119  ;;  %1123 = vtanh.f32 %v457_v17  ;;  %615 = vmatpush.msra.mxu1 %v1118_v19 }
  0xa7   : > { %v1122_v21 = vpop.eup %1121  ;;  %1125 = vtanh.f32 %v458_v18  ;;  %575 = vmatpush.msra.mxu0 %v1120_v20 }
  0xa8   : > { %616 = vmatpush.msra.mxu1 %v1122_v21 }
  0xab   : > { %v424_v27 = vpop.permute.xlu0 %423  ;;  %v345_v34 = vpop.permute.xlu1 %344 }
  0xac   : > { %v1124_v28 = vpop.eup %1123  ;;  %v455_v30 = vadd.f32 %v424_v27, %v391_v25  ;;  %v456_v31 = vadd.f32 %v424_v27, %v392_v26  ;;  %v387_v35 = vmul.f32 %v1497_v45, %v345_v34  ;;  %v388_v36 = vmul.f32 %v1499_v46, %v345_v34 }
  0xad   : > { %v1126_v32 = vpop.eup %1125  ;;  %576 = vmatpush.msra.mxu0 %v1124_v28 }
  0xae   : > { %1127 = vtanh.f32 %v455_v30  ;;  %617 = vmatpush.msra.mxu1 %v1126_v32  ;;  %v502_v30 = vpop.permute.xlu2 %501 }
  0xaf   : > { %1129 = vtanh.f32 %v456_v31 }
  0xb0   : > { %1131 = vtanh.f32 %v453_v29 }
  0xb1   : > { %1133 = vtanh.f32 %v454_v33 }
  0xb3   : > { %v414_v37 = vpop.permute.xlu0 %413  ;;  %v537_v2 = vpop.permute.xlu1 %536 }
  0xb4   : > { %v1128_v38 = vpop.eup %1127  ;;  %v451_v39 = vadd.f32 %v414_v37, %v387_v35  ;;  %v452_v40 = vadd.f32 %v414_v37, %v388_v36 }
  0xb5   : > { %v1130_v41 = vpop.eup %1129  ;;  %577 = vmatpush.msra.mxu0 %v1128_v38 }
  0xb6   : > { %v1132_v42 = vpop.eup %1131  ;;  %1135 = vtanh.f32 %v451_v39  ;;  %618 = vmatpush.msra.mxu1 %v1130_v41 }
  0xb7   : > { %v1134_v43 = vpop.eup %1133  ;;  %1137 = vtanh.f32 %v452_v40  ;;  %578 = vmatpush.msra.mxu0 %v1132_v42 }
  0xb8   : > { %619 = vmatpush.msra.mxu1 %v1134_v43 }
  0xbb   : > { %v527_v6 = vpop.permute.xlu0 %526  ;;  %v522_v7 = vpop.permute.xlu1 %521 }
  0xbc   : > { %v1136_v45 = vpop.eup %1135 }
  0xbd   : > { %v1138_v46 = vpop.eup %1137  ;;  %579 = vmatpush.msra.mxu0 %v1136_v45 }
  0xbe   : > { %620 = vmatpush.msra.mxu1 %v1138_v46  ;;  %1028 = vmatmul.msk.f32.vlgmr.msra.gmra.mxu0 %vm539_vm0, %v483_v44 }
  0xbf   : > { %1036 = vmatmul.msk.f32.vlgmr.msra.gmra.mxu1 %vm539_vm0, %v483_v44  ;;  %v662_v44 = vld [vmem:[%s1632_s3] sm:$0xff] }
  0xc3   : > { %v512_v20 = vpop.permute.xlu0 %511  ;;  %v507_v25 = vpop.permute.xlu1 %506 }
  0xc6   : > { %1029 = vmatmul.msk.f32.gmra.mxu0 %vm539_vm0, %v484_v47 }
  0xc7   : > { %1037 = vmatmul.msk.f32.gmra.mxu1 %vm539_vm0, %v484_v47  ;;  %v663_v47 = vld [vmem:[%s1632_s3 + $0x8] sm:$0xff] }
  0xce   : > { %1030 = vmatmul.msk.f32.gmra.mxu0 %vm539_vm0, %v485_v48 }
  0xcf   : > { %1038 = vmatmul.msk.f32.gmra.mxu1 %vm539_vm0, %v485_v48  ;;  %v664_v48 = vld [vmem:[%s1632_s3 + $0x10] sm:$0xff] }
  0xd6   : > { %1031 = vmatmul.msk.f32.gmra.mxu0 %vm539_vm0, %v486_v49 }
  0xd7   : > { %1039 = vmatmul.msk.f32.gmra.mxu1 %vm539_vm0, %v486_v49  ;;  %v665_v49 = vld [vmem:[%s1632_s3 + $0x18] sm:$0xff] }
  0xde   : > { %1032 = vmatmul.msk.f32.gmra.mxu0 %vm539_vm0, %v487_v50 }
  0xdf   : > { %1040 = vmatmul.msk.f32.gmra.mxu1 %vm539_vm0, %v487_v50  ;;  %v666_v50 = vld [vmem:[%s1632_s3 + $0x20] sm:$0xff] }
  0xe6   : > { %1033 = vmatmul.msk.f32.gmra.mxu0 %vm539_vm0, %v488_v51 }
  0xe7   : > { %1041 = vmatmul.msk.f32.gmra.mxu1 %vm539_vm0, %v488_v51  ;;  %v667_v51 = vld [vmem:[%s1632_s3 + $0x28] sm:$0xff] }
  0xee   : > { %1034 = vmatmul.msk.f32.gmra.mxu0 %vm539_vm0, %v489_v52 }
  0xef   : > { %1042 = vmatmul.msk.f32.gmra.mxu1 %vm539_vm0, %v489_v52  ;;  %v668_v52 = vld [vmem:[%s1632_s3 + $0x30] sm:$0xff] }
  0xf6   : > { %1035 = vmatmul.msk.f32.gmra.mxu0 %vm539_vm0, %v490_v53 }
  0xf7   : > { %1043 = vmatmul.msk.f32.gmra.mxu1 %vm539_vm0, %v490_v53  ;;  %v669_v53 = vld [vmem:[%s1632_s3 + $0x38] sm:$0xff] }
 0x13b   : > { %v581_v54 = vpop.f32.mrf.mxu0 }
 0x13c   : > { %v622_v55 = vpop.f32.mrf.mxu1  ;;  %v582_v33 = vadd.f32 %v581_v54, %v502_v30 }
 0x13d   : > { %v623_v35 = vadd.f32 %v622_v55, %v502_v30 }
 0x143   : > { %v584_v56 = vpop.f32.mrf.mxu0 }
 0x144   : > { %v625_v57 = vpop.f32.mrf.mxu1  ;;  %v585_v28 = vadd.f32 %v584_v56, %v507_v25 }
 0x145   : > { %v626_v31 = vadd.f32 %v625_v57, %v507_v25 }
 0x14b   : > { %v587_v58 = vpop.f32.mrf.mxu0 }
 0x14c   : > { %v628_v59 = vpop.f32.mrf.mxu1  ;;  %v588_v23 = vadd.f32 %v587_v58, %v512_v20  ;;  %v681_v58 = vpop.permute.xlu0 %680 }
 0x14d   : > { %v629_v26 = vadd.f32 %v628_v59, %v512_v20 }
 0x153   : > { %v590_v60 = vpop.f32.mrf.mxu0 }
 0x154   : > { %v631_v61 = vpop.f32.mrf.mxu1  ;;  %v591_v19 = vadd.f32 %v590_v60, %v517_v12 }
 0x155   : > { %v632_v21 = vadd.f32 %v631_v61, %v517_v12  ;;  %v686_v61 = vpop.permute.xlu1 %685 }
 0x15b   : > { %v593_v62 = vpop.f32.mrf.mxu0 }
 0x15c   : > { %v634_v63 = vpop.f32.mrf.mxu1  ;;  %v594_v17 = vadd.f32 %v593_v62, %v522_v7  ;;  %v691_v62 = vpop.permute.xlu2 %690 }
 0x15d   : > { %v635_v18 = vadd.f32 %v634_v63, %v522_v7 }
 0x163   : > { %v596_v0 = vpop.f32.mrf.mxu0 }
 0x164   : > { %v637_v1 = vpop.f32.mrf.mxu1  ;;  %v597_v15 = vadd.f32 %v596_v0, %v527_v6  ;;  %v696_v0 = vpop.permute.xlu0 %695 }
 0x165   : > { %v638_v16 = vadd.f32 %v637_v1, %v527_v6 }
 0x16b   : > { %v599_v4 = vpop.f32.mrf.mxu0 }
 0x16c   : > { %v640_v5 = vpop.f32.mrf.mxu1  ;;  %v600_v9 = vadd.f32 %v599_v4, %v532_v3  ;;  %v851_v6 = vpop.permute.xlu0 %850 }
 0x16d   : > { %v641_v13 = vadd.f32 %v640_v5, %v532_v3  ;;  %v706_v3 = vpop.permute.xlu2 %705 }
 0x173   : > { %v602_v8 = vpop.f32.mrf.mxu0 }
 0x174   : > { %v603_v10 = vadd.f32 %v602_v8, %v537_v2  ;;  %v643_v11 = vpop.f32.mrf.mxu1 }
 0x175   : > { %v644_v14 = vadd.f32 %v643_v11, %v537_v2  ;;  %v701_v2 = vpop.permute.xlu1 %700 }
 0x176   : > { %1139 = vtanh.f32 %v603_v10 }
 0x177   : > { %1141 = vtanh.f32 %v644_v14 }
 0x178   : > { %1143 = vtanh.f32 %v600_v9 }
 0x179   : > { %1145 = vtanh.f32 %v641_v13  ;;  %v711_v13 = vpop.permute.xlu2 %710 }
 0x17a   : > { %1147 = vtanh.f32 %v597_v15 }
 0x17b   : > { %1149 = vtanh.f32 %v638_v16 }
 0x17c   : > { %v1140_v22 = vpop.eup %1139  ;;  %1151 = vtanh.f32 %v594_v17 }
 0x17d   : > { %v1142_v24 = vpop.eup %1141  ;;  %1153 = vtanh.f32 %v635_v18  ;;  %750 = vmatpush.msra.mxu2 %v1140_v22  ;;  %v856_v9 = vpop.permute.xlu1 %855 }
 0x17e   : > { %v1144_v27 = vpop.eup %1143  ;;  %1155 = vtanh.f32 %v591_v19  ;;  %791 = vmatpush.msra.mxu3 %v1142_v24  ;;  %v861_v19 = vpop.permute.xlu0 %860 }
 0x17f   : > { %v1146_v29 = vpop.eup %1145  ;;  %1157 = vtanh.f32 %v632_v21  ;;  %751 = vmatpush.msra.mxu2 %v1144_v27 }
 0x180   : > { %v1148_v32 = vpop.eup %1147  ;;  %1159 = vtanh.f32 %v588_v23  ;;  %792 = vmatpush.msra.mxu3 %v1146_v29 }
 0x181   : > { %v1150_v34 = vpop.eup %1149  ;;  %1161 = vtanh.f32 %v629_v26  ;;  %752 = vmatpush.msra.mxu2 %v1148_v32 }
 0x182   : > { %v1152_v36 = vpop.eup %1151  ;;  %1163 = vtanh.f32 %v585_v28  ;;  %793 = vmatpush.msra.mxu3 %v1150_v34  ;;  %v866_v34 = vpop.permute.xlu2 %865 }
 0x183   : > { %v1154_v37 = vpop.eup %1153  ;;  %1165 = vtanh.f32 %v626_v31  ;;  %753 = vmatpush.msra.mxu2 %v1152_v36 }
 0x184   : > { %v1156_v38 = vpop.eup %1155  ;;  %1167 = vtanh.f32 %v582_v33  ;;  %794 = vmatpush.msra.mxu3 %v1154_v37 }
 0x185   : > { %v1158_v39 = vpop.eup %1157  ;;  %1169 = vtanh.f32 %v623_v35  ;;  %754 = vmatpush.msra.mxu2 %v1156_v38  ;;  %v716_v28 = vpop.permute.xlu1 %715 }
 0x186   : > { %v1160_v40 = vpop.eup %1159  ;;  %795 = vmatpush.msra.mxu3 %v1158_v39 }
 0x187   : > { %v1162_v41 = vpop.eup %1161  ;;  %755 = vmatpush.msra.mxu2 %v1160_v40 }
 0x188   : > { %v1164_v42 = vpop.eup %1163  ;;  %796 = vmatpush.msra.mxu3 %v1162_v41 }
 0x189   : > { %v1166_v43 = vpop.eup %1165  ;;  %756 = vmatpush.msra.mxu2 %v1164_v42 }
 0x18a   : > { %v1168_v45 = vpop.eup %1167  ;;  %797 = vmatpush.msra.mxu3 %v1166_v43  ;;  %v871_v43 = vpop.permute.xlu0 %870 }
 0x18b   : > { %v1170_v46 = vpop.eup %1169  ;;  %757 = vmatpush.msra.mxu2 %v1168_v45 }
 0x18c   : > { %798 = vmatpush.msra.mxu3 %v1170_v46  ;;  %1044 = vmatmul.msk.f32.vlgmr.msra.gmra.mxu2 %vm539_vm0, %v662_v44 }
 0x18d   : > { %1052 = vmatmul.msk.f32.vlgmr.msra.gmra.mxu3 %vm539_vm0, %v662_v44 }
 0x194   : > { %1045 = vmatmul.msk.f32.gmra.mxu2 %vm539_vm0, %v663_v47 }
 0x195   : > { %1053 = vmatmul.msk.f32.gmra.mxu3 %vm539_vm0, %v663_v47 }
 0x19c   : > { %1046 = vmatmul.msk.f32.gmra.mxu2 %vm539_vm0, %v664_v48 }
 0x19d   : > { %1054 = vmatmul.msk.f32.gmra.mxu3 %vm539_vm0, %v664_v48 }
 0x1a4   : > { %1047 = vmatmul.msk.f32.gmra.mxu2 %vm539_vm0, %v665_v49 }
 0x1a5   : > { %1055 = vmatmul.msk.f32.gmra.mxu3 %vm539_vm0, %v665_v49 }
 0x1ac   : > { %1048 = vmatmul.msk.f32.gmra.mxu2 %vm539_vm0, %v666_v50 }
 0x1ad   : > { %1056 = vmatmul.msk.f32.gmra.mxu3 %vm539_vm0, %v666_v50 }
 0x1b4   : > { %1049 = vmatmul.msk.f32.gmra.mxu2 %vm539_vm0, %v667_v51 }
 0x1b5   : > { %1057 = vmatmul.msk.f32.gmra.mxu3 %vm539_vm0, %v667_v51 }
 0x1bc   : > { %1050 = vmatmul.msk.f32.gmra.mxu2 %vm539_vm0, %v668_v52 }
 0x1bd   : > { %1058 = vmatmul.msk.f32.gmra.mxu3 %vm539_vm0, %v668_v52 }
 0x1c4   : > { %1051 = vmatmul.msk.f32.gmra.mxu2 %vm539_vm0, %v669_v53 }
 0x1c5   : > { %1059 = vmatmul.msk.f32.gmra.mxu3 %vm539_vm0, %v669_v53 }
 0x20f   : > { %v759_v54 = vpop.f32.mrf.mxu2 }
 0x210   : > { %v800_v55 = vpop.f32.mrf.mxu3  ;;  %v760_v7 = vadd.f32 %v759_v54, %v681_v58 }
 0x211   : > { %v801_v8 = vadd.f32 %v800_v55, %v681_v58 }
 0x212   : > { %1171 = vtanh.f32 %v760_v7 }
 0x213   : > { %1173 = vtanh.f32 %v801_v8 }
 0x217   : > { %v762_v56 = vpop.f32.mrf.mxu2 }
 0x218   : > { %v803_v57 = vpop.f32.mrf.mxu3  ;;  %v763_v10 = vadd.f32 %v762_v56, %v686_v61  ;;  %v1172_v22 = vpop.eup %1171 }
 0x219   : > { %v804_v11 = vadd.f32 %v803_v57, %v686_v61  ;;  %v1174_v24 = vpop.eup %1173  ;;  %v888_v40 = vmul.f32 %v1172_v22, %v851_v6 }
 0x21a   : > { %1175 = vtanh.f32 %v763_v10  ;;  %v889_v44 = vmul.f32 %v1174_v24, %v851_v6 }
 0x21b   : > { %1177 = vtanh.f32 %v804_v11  ;;  %v886_v11 = vpop.permute.xlu0 %885 }
 0x21f   : > { %v765_v59 = vpop.f32.mrf.mxu2 }
 0x220   : > { %v806_v60 = vpop.f32.mrf.mxu3  ;;  %v766_v14 = vadd.f32 %v765_v59, %v691_v62  ;;  %v1176_v27 = vpop.eup %1175 }
 0x221   : > { %v807_v16 = vadd.f32 %v806_v60, %v691_v62  ;;  %v1178_v31 = vpop.eup %1177  ;;  %v890_v36 = vmul.f32 %v1176_v27, %v856_v9  ;;  %v876_v60 = vpop.permute.xlu1 %875 }
 0x222   : > { %1179 = vtanh.f32 %v766_v14  ;;  %v891_v38 = vmul.f32 %v1178_v31, %v856_v9 }
 0x223   : > { %1181 = vtanh.f32 %v807_v16  ;;  %v904_v47 = vadd.f32 %v890_v36, %v888_v40 }
 0x224   : > { %v917_v51 = vadd.f32 %v891_v38, %v889_v44 }
 0x227   : > { %v768_v63 = vpop.f32.mrf.mxu2 }
 0x228   : > { %v809_v1 = vpop.f32.mrf.mxu3  ;;  %v769_v17 = vadd.f32 %v768_v63, %v696_v0  ;;  %v1180_v33 = vpop.eup %1179 }
 0x229   : > { %v810_v18 = vadd.f32 %v809_v1, %v696_v0  ;;  %v1182_v35 = vpop.eup %1181  ;;  %v892_v41 = vmul.f32 %v1180_v33, %v861_v19 }
 0x22a   : > { %1183 = vtanh.f32 %v769_v17  ;;  %v893_v45 = vmul.f32 %v1182_v35, %v861_v19 }
 0x22b   : > { %1185 = vtanh.f32 %v810_v18  ;;  %v905_v56 = vadd.f32 %v904_v47, %v892_v41 }
 0x22c   : > { %v918_v61 = vadd.f32 %v917_v51, %v893_v45 }
 0x22f   : > { %v771_v4 = vpop.f32.mrf.mxu2 }
 0x230   : > { %v812_v5 = vpop.f32.mrf.mxu3  ;;  %v772_v20 = vadd.f32 %v771_v4, %v701_v2  ;;  %v1184_v37 = vpop.eup %1183 }
 0x231   : > { %v813_v21 = vadd.f32 %v812_v5, %v701_v2  ;;  %v1186_v39 = vpop.eup %1185  ;;  %v894_v48 = vmul.f32 %v1184_v37, %v866_v34  ;;  %v881_v2 = vpop.permute.xlu2 %880 }
 0x232   : > { %1187 = vtanh.f32 %v772_v20  ;;  %v895_v52 = vmul.f32 %v1186_v39, %v866_v34  ;;  %v945_v34 = vlaneseq }
 0x233   : > { %1189 = vtanh.f32 %v813_v21  ;;  %v906_v0 = vadd.f32 %v905_v56, %v894_v48 }
 0x234   : > { %vm947_vm2 = vcmp.lt.s32.totalorder %v945_v34, 256 }
 0x237   : > { %v774_v12 = vpop.f32.mrf.mxu2 }
 0x238   : > { %v815_v15 = vpop.f32.mrf.mxu3  ;;  %v775_v23 = vadd.f32 %v774_v12, %v706_v3  ;;  %v1188_v42 = vpop.eup %1187 }
 0x239   : > { %v816_v25 = vadd.f32 %v815_v15, %v706_v3  ;;  %v1190_v46 = vpop.eup %1189  ;;  %v896_v57 = vmul.f32 %v1188_v42, %v871_v43  ;;  %v919_v3 = vadd.f32 %v918_v61, %v895_v52 }
 0x23a   : > { %1191 = vtanh.f32 %v775_v23  ;;  %v897_v62 = vmul.f32 %v1190_v46, %v871_v43 }
 0x23b   : > { %1193 = vtanh.f32 %v816_v25  ;;  %v907_v5 = vadd.f32 %v906_v0, %v896_v57 }
 0x23c   : > { %v920_v7 = vadd.f32 %v919_v3, %v897_v62 }
 0x23f   : > { %v777_v26 = vpop.f32.mrf.mxu2 }
 0x240   : > { %v778_v29 = vadd.f32 %v777_v26, %v711_v13  ;;  %v818_v30 = vpop.f32.mrf.mxu3  ;;  %v1192_v50 = vpop.eup %1191 }
 0x241   : > { %v819_v32 = vadd.f32 %v818_v30, %v711_v13  ;;  %v1194_v55 = vpop.eup %1193  ;;  %v898_v1 = vmul.f32 %v1192_v50, %v876_v60 }
 0x242   : > { %1195 = vtanh.f32 %v778_v29  ;;  %v899_v4 = vmul.f32 %v1194_v55, %v876_v60 }
 0x243   : > { %1197 = vtanh.f32 %v819_v32  ;;  %v908_v9 = vadd.f32 %v907_v5, %v898_v1 }
 0x244   : > { %v921_v12 = vadd.f32 %v920_v7, %v899_v4 }
 0x247   : > { %v780_v49 = vpop.f32.mrf.mxu2 }
 0x248   : > { %v781_v53 = vadd.f32 %v780_v49, %v716_v28  ;;  %v821_v54 = vpop.f32.mrf.mxu3  ;;  %v1196_v59 = vpop.eup %1195 }
 0x249   : > { %v822_v58 = vadd.f32 %v821_v54, %v716_v28  ;;  %v1198_v63 = vpop.eup %1197  ;;  %v900_v6 = vmul.f32 %v1196_v59, %v881_v2  ;;  %v934_v28 = vpop.permute.xlu1 %933 }
 0x24a   : > { %1199 = vtanh.f32 %v781_v53  ;;  %v901_v8 = vmul.f32 %v1198_v63, %v881_v2  ;;  %v936_v31 = vperm.slane %v934_v28, 0 }
 0x24b   : > { %1201 = vtanh.f32 %v822_v58  ;;  %v909_v14 = vadd.f32 %v908_v9, %v900_v6 }
 0x24c   : > { %v922_v16 = vadd.f32 %v921_v12, %v901_v8 }
 0x250   : > { %v1200_v10 = vpop.eup %1199 }
 0x251   : > { %v1202_v13 = vpop.eup %1201  ;;  %v902_v15 = vmul.f32 %v1200_v10, %v886_v11 }
 0x252   : > { %v903_v17 = vmul.f32 %v1202_v13, %v886_v11 }
 0x253   : > { %v910_v18 = vadd.f32 %v909_v14, %v902_v15 }
 0x254   : > { %v923_v19 = vadd.f32 %v922_v16, %v903_v17 }
 0x255   : > { %v911_v20 = vrot.slane %v910_v18, 4 }
 0x256   : > { %v924_v21 = vrot.slane %v923_v19, 4 }
 0x257   : > { %v912_v22 = vadd.f32 %v911_v20, %v910_v18 }
 0x258   : > { %v925_v23 = vadd.f32 %v924_v21, %v923_v19 }
 0x259   : > { %v913_v24 = vrot.slane %v912_v22, 2 }
 0x25a   : > { %v926_v25 = vrot.slane %v925_v23, 2 }
 0x25b   : > { %v914_v26 = vadd.f32 %v913_v24, %v912_v22 }
 0x25c   : > { %v927_v27 = vadd.f32 %v926_v25, %v925_v23 }
 0x25d   : > { %v915_v29 = vrot.slane %v914_v26, 1 }
 0x25e   : > { %v928_v30 = vrot.slane %v927_v27, 1 }
 0x25f   : > { %v916_v32 = vadd.f32 %v915_v29, %v914_v26 }
 0x260   : > { %v929_v33 = vadd.f32 %v928_v30, %v927_v27 }
 0x261   : > { %v937_v36 = vadd.f32 %v936_v31, %v916_v32 }
 0x262   : > { %v938_v35 = vadd.f32 %v936_v31, %v929_v33 }
 0x264   : > { %v941_v37 = vrot.slane %v938_v35, 7 }
 0x266   : > { %v943_v38 = vsel %vm942_vm1, %v937_v36, %v941_v37 }
 0x267   : > { %949 = vst.msk [vmem:[%s326_s27] sm:$0x3] %vm947_vm2, %v943_v38 }
 0x268   : > { %1230 = shalt.err (!%p1227_p3)
}
 0x269   : > { %1064 = dma.vmem_to_hbm [thread:$0]  (%p1358_p5), %s964_s8, 32, %s966_s28, %s951_s29  }
 0x26a PF: > { %p1070_p4 = scmp.ge.s32.totalorder %s1265_s14, 2  ;;  %s977_s18 = sand.u32 1, %s1253_s11  }
 0x26b   : > { %s978_s25 = scalar_lea.sflag [#allocation4], %s977_s18 }
 0x26c   : > { %p1067_p7 = pnand %p1070_p4, %p1362_p6 }
 0x26e   : > { %p1068_p8 = pneg %p1067_p7 }
 0x270   : > { %1248 = dma.done.wait (%p1068_p8), %s978_s25, 32  }
 0x271   : > { %1250 = vsyncadd (%p1068_p8), %s978_s25, 4294967264  ;;  %p21_p9 = scmp.ge.s32.totalorder %s1344_s16, 4   ;;  %s1641_s11 = smov %s1257_s12 }
 0x272   : > { %s1642_s12 = smov %s1261_s13  ;;  %s1643_s13 = smov %s1356_s19 }
 0x273   : > { %s1644_s14 = smov %s1344_s16  ;;  %23 = sbr.rel (!%p21_p9) target bundleno = 6 (0x6), region = 91 }
 0x278   :  { %984 = vsyncpa [#allocation4], 1 }
 0x279   :  { %986 = vsyncpa [#allocation4 + $0x1], 1 }

</bundles_post_ra>
